<compile_context>
chip_gen: v7x
topology: tpu7x:2x2x1
jax: 0.10.0
libtpu: 0.0.40
codegen_flags: <defaults>
</compile_context>

<pallas_src>
import jax
import jax.numpy as jnp
from jax.experimental import pallas as pl
from jax.experimental.pallas import tpu as pltpu


def _gather_kernel(task_ref, p_ref, o_ref):
    # task_ref: SMEM (1,) int32 scalar-prefetch ref (consumed by the index_map).
    # p_ref:    (1, nL, Lp, E) VMEM block = e_p slab of the selected task.
    # o_ref:    (nL, Lp, E)    VMEM output block.
    del task_ref
    o_ref[...] = p_ref[0]


def gather_prompts(e_p, task_id):
    """e_p: (n_tasks, nL, Lp, E); task_id: scalar int (python or traced).

    Returns the stacked prompts for task_id: (nL, Lp, E).
    """
    n_tasks, nL, Lp, E = e_p.shape
    task_arr = jnp.asarray(task_id, jnp.int32).reshape((1,))

    grid_spec = pltpu.PrefetchScalarGridSpec(
        num_scalar_prefetch=1,
        grid=(1,),
        in_specs=[
            # Data-dependent block selection: the task axis index comes from
            # the prefetched scalar, all layers are fetched in one block.
            pl.BlockSpec((1, nL, Lp, E),
                         lambda i, task_ref: (task_ref[0], 0, 0, 0)),
        ],
        out_specs=pl.BlockSpec((nL, Lp, E),
                               lambda i, task_ref: (0, 0, 0)),
    )
    return pl.pallas_call(
        _gather_kernel,
        out_shape=jax.ShapeDtypeStruct((nL, Lp, E), e_p.dtype),
        grid_spec=grid_spec,
        compiler_params=pltpu.CompilerParams(
            dimension_semantics=("arbitrary",)),
    )(task_arr, e_p)


class FixedPromptsTaskIncPallas:
    """JAX/Pallas port of FixedPromptsTaskInc."""

    def __init__(self, n_tasks, emb_d, num_prompts, num_layers, seed=0):
        self.emb_d = emb_d
        self.e_layers = list(range(num_layers))
        self.e_p_length = int(num_prompts)
        self.n_tasks = n_tasks
        self.task_count = 0

        # torch: per layer, tensor_prompt(n_tasks, Lp, emb_d) with uniform_(0,1).
        # Stored stacked task-major (n_tasks, nL, Lp, E) so the kernel gathers
        # all layers for a task in a single contiguous DMA.
        key = jax.random.PRNGKey(seed)
        self.e_p = jax.random.uniform(
            key, (n_tasks, num_layers, self.e_p_length, emb_d), jnp.float32)

    def process_task_count(self, task_id):
        self.task_count = int(task_id)

    def forward(self, nL, task_id):
        assert nL == len(self.e_layers)
        return gather_prompts(self.e_p, task_id)


if __name__ == "__main__":
    n_tasks = 4
    emb_d = 128        # lane-dense last dim (multiple of 128)
    num_prompts = 8
    num_layers = 4

    mod = FixedPromptsTaskIncPallas(n_tasks, emb_d, num_prompts, num_layers, seed=0)
    mod.process_task_count(2)
    task_id = 2

    p_out = mod.forward(num_layers, task_id)
    jax.block_until_ready(p_out)

    # Pure-JAX reference of the torch forward: stack_l(e_p_l[task_id]).
    ref = mod.e_p[task_id]
    assert p_out.shape == (num_layers, num_prompts, emb_d)
    assert jnp.allclose(p_out, ref), "prompt gather mismatch"

    # Also exercise a traced (dynamic) task_id through the scalar-prefetch path.
    p_jit = jax.jit(lambda t: mod.forward(num_layers, t))(jnp.int32(1))
    jax.block_until_ready(p_jit)
    assert jnp.allclose(p_jit, mod.e_p[1]), "jitted prompt gather mismatch"

    print("KERNEL_OK")
</pallas_src>

<mosaic_0001>
module attributes {stable_mosaic.version = 11 : i64} {
  func.func @_gather_kernel(%arg0: i32, %arg1: memref<1xi32, #tpu.memory_space<smem>>, %arg2: memref<1x4x8x128xf32, #tpu.memory_space<vmem>>, %arg3: memref<4x8x128xf32, #tpu.memory_space<vmem>>) attributes {dimension_semantics = [#tpu.dimension_semantics<arbitrary>], iteration_bounds = array<i64: 1>, scalar_prefetch = 1 : i64, scratch_operands = 0 : i64, tpu.core_type = #tpu.core_type<tc>, window_params = [{transform_indices = @transform_0, window_bounds = array<i64: 1, 4, 8, 128>}, {pipeline_mode = #tpu.pipeline_mode<synchronous>, transform_indices = @transform_1, window_bounds = array<i64: 4, 8, 128>}]} {
    %c0 = arith.constant 0 : index
    %c0_0 = arith.constant 0 : index
    %c0_1 = arith.constant 0 : index
    %c0_2 = arith.constant 0 : index
    %0 = vector.load %arg2[%c0, %c0_0, %c0_1, %c0_2] : memref<1x4x8x128xf32, #tpu.memory_space<vmem>>, vector<1x4x8x128xf32>
    %1 = vector.shape_cast %0 : vector<1x4x8x128xf32> to vector<4x8x128xf32>
    %c0_3 = arith.constant 0 : index
    %c0_4 = arith.constant 0 : index
    %c0_5 = arith.constant 0 : index
    %2 = vector.load %arg3[%c0_3, %c0_4, %c0_5] : memref<4x8x128xf32, #tpu.memory_space<vmem>>, vector<4x8x128xf32>
    tpu.vector_store %arg3[%c0_3, %c0_4, %c0_5], %1 {strides = array<i32>} : memref<4x8x128xf32, #tpu.memory_space<vmem>>, vector<4x8x128xf32>,
    return
  }
  func.func @transform_0(%arg0: i32, %arg1: memref<1xi32, #tpu.memory_space<smem>>) -> (i32, i32, i32, i32) {
    %c0 = arith.constant 0 : index
    %0 = memref.load %arg1[%c0] : memref<1xi32, #tpu.memory_space<smem>>
    %c0_i32 = arith.constant 0 : i32
    %c0_i32_0 = arith.constant 0 : i32
    %c0_i32_1 = arith.constant 0 : i32
    %c0_i32_2 = arith.constant 0 : i32
    return %0, %c0_i32, %c0_i32_0, %c0_i32_1 : i32, i32, i32, i32
  }
  func.func @transform_1(%arg0: i32, %arg1: memref<1xi32, #tpu.memory_space<smem>>) -> (i32, i32, i32) {
    %c0_i32 = arith.constant 0 : i32
    %c0_i32_0 = arith.constant 0 : i32
    %c0_i32_1 = arith.constant 0 : i32
    %c0_i32_2 = arith.constant 0 : i32
    return %c0_i32, %c0_i32_0, %c0_i32_1 : i32, i32, i32
  }
}

</mosaic_0001>

<bundles_post_ra>
// kernel: tpu_custom_call.1
= control target key start
LH: loop header
LB: loop body
LE: loop exit
PB: predicated region body
PF: predicated region fallthrough
CT: control target
= control target key end

     0   :  { %8 = vsyncpa [#allocation5], 0  ;;  %s163_s0 = inlined_call_operand.<no memory space> [shape: s32[1], index: 0, kind: input, shape index: {}]   ;;  %s164_s1 = inlined_call_operand.hbm [shape: f32[4,4,8,128], index: 1, kind: input, shape index: {}]   ;;  %s165_s2 = inlined_call_operand.hbm [shape: f32[4,8,128], index: 2, kind: output, shape index: {}]  }
   0x1   :  { %9 = vsyncpa [#allocation6], 0  ;;  %s59_s11 = sshll.u32 %s163_s0, 9  ;;  %s114_s15 = smov [#allocation4]  }
   0x2   :  { %s18_s14 = scalar_lea.hbm %s164_s1, %s59_s11  ;;  %s19_s16 = sshll.u32 %s114_s15, 4  ;;  %s20_s16 = int_to_ptr.vmem [resolvable:$true] %s19_s16 }
   0x3   :  { %s64_s17 = scalar_lea.hbm %s18_s14, 512  ;;  %s66_s20 = scalar_lea.hbm %s164_s1, 2048 }
   0x4   :  { %p65_p0 = scmp.ne.s32.totalorder %s18_s14, %s64_s17  ;;  %p67_p1 = scmp.lt.u32.totalorder %s18_s14, %s164_s1 }
   0x5   :  { %p68_p2 = scmp.lt.u32.totalorder %s66_s20, %s64_s17  ;;  %p70_p4 = scmp.lt.u32.totalorder %s64_s17, %s18_s14 }
   0x7   :  { %p69_p3 = por %p68_p2, %p67_p1 }
   0x9   :  { %p71_p5 = por %p70_p4, %p69_p3 }
   0xb   :  { %p72_p6 = pnand %p71_p5, %p65_p0 }
   0xd   :  { %75 = shalt.err (!%p72_p6)
}
   0xe   :  { %s76_s0 = scalar_lea.vmem %s20_s16, 512  ;;  %p81_p8 = scmp.lt.s32.totalorder %s20_s16, %s20_s16 }
   0xf   :  { %p77_p7 = scmp.ne.s32.totalorder %s20_s16, %s76_s0  ;;  %p82_p9 = scmp.lt.s32.totalorder %s76_s0, %s76_s0 }
  0x11   :  { %p83_p10 = por %p82_p9, %p81_p8 }
  0x13   :  { %p84_p11 = pnand %p83_p10, %p77_p7 }
  0x15   :  { %87 = shalt.err (!%p84_p11)
}
  0x16   :  { %s115_s23 = smov 128   ;;  %s116_s24 = smov 8  }
  0x17   :  { %25 = dma.hbm_to_vmem [thread:$0]  %s18_s14, 512, %s20_s16, [#allocation5], %s115_s23, %s115_s23, %s116_s24  }
  0x18   :  { %110 = dma.done.wait [#allocation5], 512  }
  0x19   :  { %111 = vsyncadd [#allocation5], 4294966784  ;;  %s117_s1 = smov [#allocation7]   ;;  %v30_v0 = vld [vmem:[#allocation4] sm:$0xff]  ;;  %v31_v1 = vld [vmem:[#allocation4 + $0x8] sm:$0xff] }
  0x1a   :  { %s43_s25 = sshll.u32 %s117_s1, 4  ;;  %v32_v2 = vld [vmem:[#allocation4 + $0x10] sm:$0xff]  ;;  %34 = vst [vmem:[#allocation7] sm:$0xff] %v30_v0  ;;  %35 = vst [vmem:[#allocation7 + $0x8] sm:$0xff] %v31_v1  ;;  %v33_v3 = vld [vmem:[#allocation4 + $0x18] sm:$0xff]  ;;  %s44_s25 = int_to_ptr.vmem [resolvable:$true] %s43_s25 }
  0x1b   :  { %36 = vst [vmem:[#allocation7 + $0x10] sm:$0xff] %v32_v2  ;;  %37 = vst [vmem:[#allocation7 + $0x18] sm:$0xff] %v33_v3  ;;  %s88_s26 = scalar_lea.vmem %s44_s25, 512  ;;  %p93_p13 = scmp.lt.s32.totalorder %s44_s25, %s44_s25 }
  0x1c   :  { %p89_p12 = scmp.ne.s32.totalorder %s44_s25, %s88_s26  ;;  %p94_p0 = scmp.lt.s32.totalorder %s88_s26, %s88_s26 }
  0x1e   :  { %p95_p1 = por %p94_p0, %p93_p13 }
  0x20   :  { %p96_p2 = pnand %p95_p1, %p89_p12 }
  0x22   :  { %99 = shalt.err (!%p96_p2)
}
  0x23   :  { %s100_s29 = scalar_lea.hbm %s165_s2, 512 }
  0x24   :  { %p101_p3 = scmp.ne.s32.totalorder %s165_s2, %s100_s29  ;;  %p104_p4 = scmp.lt.u32.totalorder %s100_s29, %s165_s2 }
  0x26   :  { %p106_p5 = pnand %p104_p4, %p101_p3 }
  0x28   :  { %109 = shalt.err (!%p106_p5)
}
  0x29   :  { %49 = dma.vmem_to_hbm [thread:$0]  %s44_s25, 512, %s165_s2, [#allocation6], %s115_s23, %s115_s23, %s116_s24  }
  0x2a   :  { %112 = dma.done.wait [#allocation6], 512  }
  0x2b   :  { %113 = vsyncadd [#allocation6], 4294966784 }
  0x2c   :  { %53 = vsyncpa [#allocation5], 1 }
  0x2d   :  { %54 = vsyncpa [#allocation6], 1 }

</bundles_post_ra>
